<compile_context>
chip_gen: v5e
topology: v5e:2x2
jax: 0.10.0
libtpu: 0.0.40
codegen_flags: <defaults>
</compile_context>

<pallas_src>
import jax
import jax.numpy as jnp
from jax.experimental import pallas as pl
from jax.experimental.pallas import tpu as pltpu

_LANE = 128     # lane width of a vreg (last dim)
_SUBLANE = 8    # sublane count of a vreg (second-to-last dim)


def _round_up(n, m):
    return ((n + m - 1) // m) * m


# ----------------------------------------------------------------------------
# Kernels
# ----------------------------------------------------------------------------
def _head_mlp_kernel(x_ref, w1_ref, b1_ref, w2_ref, b2_ref, o_ref):
    """y = relu(x @ W1 + b1) @ W2 + b2 for one batch tile (f32 accumulate)."""
    x = x_ref[...].astype(w1_ref.dtype)
    z1 = jnp.dot(x, w1_ref[...], preferred_element_type=jnp.float32)
    z1 = jnp.maximum(z1 + b1_ref[...], 0.0)
    y = jnp.dot(z1.astype(w2_ref.dtype), w2_ref[...],
                preferred_element_type=jnp.float32) + b2_ref[...]
    o_ref[...] = y.astype(o_ref.dtype)


def _head_linear_kernel(x_ref, w_ref, b_ref, o_ref):
    """y = x @ W + b for one batch tile (f32 accumulate)."""
    x = x_ref[...].astype(w_ref.dtype)
    y = jnp.dot(x, w_ref[...], preferred_element_type=jnp.float32) + b_ref[...]
    o_ref[...] = y.astype(o_ref.dtype)


# ----------------------------------------------------------------------------
# Parameter preparation (done ONCE, not per forward call)
# ----------------------------------------------------------------------------
def init_head_params(key, input_dim, output_dim, hidden_dim=None):
    """PyTorch nn.Linear default init, weights stored as (in, out)."""
    def unif(k, shape, fan_in):
        bound = 1.0 / jnp.sqrt(jnp.float32(fan_in))
        return jax.random.uniform(k, shape, jnp.float32, -bound, bound)

    if hidden_dim:
        ks = jax.random.split(key, 4)
        return {
            "w1": unif(ks[0], (input_dim, hidden_dim), input_dim),
            "b1": unif(ks[1], (1, hidden_dim), input_dim),
            "w2": unif(ks[2], (hidden_dim, output_dim), hidden_dim),
            "b2": unif(ks[3], (1, output_dim), hidden_dim),
        }
    ks = jax.random.split(key, 2)
    return {
        "w1": unif(ks[0], (input_dim, output_dim), input_dim),
        "b1": unif(ks[1], (1, output_dim), input_dim),
    }


def prepare_head_params(params, compute_dtype=jnp.float32):
    """Pad lane dims to 128 once and (optionally) cast weights for the MXU.

    Padded weight columns/rows and bias columns are zero, so the padded output
    columns are exactly zero. Biases stay f32 (added to the f32 accumulator).
    """
    has_hidden = "w2" in params
    prep = {}
    if has_hidden:
        hid = params["w1"].shape[1]
        out = params["w2"].shape[1]
        hid_p = _round_up(hid, _LANE)
        out_p = _round_up(out, _LANE)
        prep["w1"] = jnp.pad(params["w1"], ((0, 0), (0, hid_p - hid))).astype(compute_dtype)
        prep["b1"] = jnp.pad(params["b1"], ((0, 0), (0, hid_p - hid)))
        prep["w2"] = jnp.pad(params["w2"], ((0, hid_p - hid), (0, out_p - out))).astype(compute_dtype)
        prep["b2"] = jnp.pad(params["b2"], ((0, 0), (0, out_p - out)))
    else:
        out = params["w1"].shape[1]
        out_p = _round_up(out, _LANE)
        prep["w1"] = jnp.pad(params["w1"], ((0, 0), (0, out_p - out))).astype(compute_dtype)
        prep["b1"] = jnp.pad(params["b1"], ((0, 0), (0, out_p - out)))
    prep["out_dim"] = int(out)   # python int; do not trace this dict through jit
    return prep


# ----------------------------------------------------------------------------
# Forward wrapper
# ----------------------------------------------------------------------------
def head_forward(x, prepared, *, block_b=512):
    """Head.forward.  x: (B, input_dim).  `prepared` from prepare_head_params.

    block_b: max batch-tile size. 512 amortizes per-step overhead well on
    v5e/v6e; on v7x prefer a value giving >= 4 grid steps so both TensorCores
    get work.
    """
    B, in_dim = x.shape
    has_hidden = "w2" in prepared
    out_dim = prepared["out_dim"]

    w1, b1 = prepared["w1"], prepared["b1"]
    if has_hidden:
        w2, b2 = prepared["w2"], prepared["b2"]
        hid_p = w1.shape[1]
        out_p = w2.shape[1]
    else:
        hid_p = 0
        out_p = w1.shape[1]

    # Balanced batch tile: cdiv grid, tile a multiple of 8 sublanes, tail block
    # wastes < 8 rows (Pallas masks the partial last block on load/store).
    n_steps = max(1, pl.cdiv(B, block_b))
    tb = _round_up(pl.cdiv(B, n_steps), _SUBLANE)
    grid = (pl.cdiv(B, tb),)

    # x block: last dim == full array dim, so no feature padding is needed.
    x_spec = pl.BlockSpec((tb, in_dim), lambda i: (i, 0))
    out_spec = pl.BlockSpec((tb, out_p), lambda i: (i, 0))

    def resident(shape):
        # Constant index_map -> block never changes; single-buffer it.
        return pl.BlockSpec(shape, lambda i: (0, 0), pipeline_mode=pl.Buffered(1))

    if has_hidden:
        weight_arrays = (w1, b1, w2, b2)
    else:
        weight_arrays = (w1, b1)
    weight_bytes = sum(int(a.size) * a.dtype.itemsize for a in weight_arrays)

    # VMEM budget: resident weights (x1) + double-buffered x/out tiles + z1.
    need = (weight_bytes
            + 2 * tb * in_dim * x.dtype.itemsize
            + 2 * tb * out_p * 4
            + tb * hid_p * 4)
    vmem_limit = int(min(max(need * 5 // 4 + (2 << 20), 8 << 20), 64 << 20))

    cparams = pltpu.CompilerParams(
        dimension_semantics=("parallel",),
        vmem_limit_bytes=vmem_limit,
    )

    if has_hidden:
        flops = 2 * B * in_dim * hid_p + 2 * B * hid_p * out_p
    else:
        flops = 2 * B * in_dim * out_p
    cost = pl.CostEstimate(
        flops=flops,
        transcendentals=0,
        bytes_accessed=int(x.size) * x.dtype.itemsize + weight_bytes + B * out_p * 4,
    )

    if has_hidden:
        out_padded = pl.pallas_call(
            _head_mlp_kernel,
            out_shape=jax.ShapeDtypeStruct((B, out_p), x.dtype),
            grid=grid,
            in_specs=[
                x_spec,
                resident((in_dim, hid_p)),
                resident((1, hid_p)),
                resident((hid_p, out_p)),
                resident((1, out_p)),
            ],
            out_specs=out_spec,
            compiler_params=cparams,
            cost_estimate=cost,
        )(x, w1, b1, w2, b2)
    else:
        out_padded = pl.pallas_call(
            _head_linear_kernel,
            out_shape=jax.ShapeDtypeStruct((B, out_p), x.dtype),
            grid=grid,
            in_specs=[
                x_spec,
                resident((in_dim, out_p)),
                resident((1, out_p)),
            ],
            out_specs=out_spec,
            compiler_params=cparams,
            cost_estimate=cost,
        )(x, w1, b1)

    if out_p == out_dim:
        return out_padded
    return out_padded[:, :out_dim]   # padded columns are exactly zero


# ----------------------------------------------------------------------------
# Pure-JAX reference (mirrors the PyTorch Head module)
# ----------------------------------------------------------------------------
def reference_head(x, p):
    if "w2" in p:
        z = jnp.maximum(x @ p["w1"] + p["b1"], 0.0)
        return z @ p["w2"] + p["b2"]
    return x @ p["w1"] + p["b1"]


if __name__ == "__main__":
    B, INPUT_DIM, HIDDEN_DIM, OUTPUT_DIM = 8, 64, 32, 32

    key = jax.random.PRNGKey(0)
    k_x, k_p1, k_p2 = jax.random.split(key, 3)
    x = jax.random.normal(k_x, (B, INPUT_DIM), jnp.float32)

    # --- Head with a hidden layer: Linear -> ReLU -> Linear (f32 path) ---
    p_mlp = init_head_params(k_p1, INPUT_DIM, OUTPUT_DIM, HIDDEN_DIM)
    prep_mlp = prepare_head_params(p_mlp)                       # pad once
    out_mlp = jax.block_until_ready(head_forward(x, prep_mlp))
    ref_mlp = reference_head(x, p_mlp)
    assert out_mlp.shape == (B, OUTPUT_DIM)
    assert jnp.allclose(out_mlp, ref_mlp, atol=1e-5, rtol=1e-5), "MLP head mismatch"

    # --- Head without a hidden layer: single Linear (f32 path) ---
    p_lin = init_head_params(k_p2, INPUT_DIM, OUTPUT_DIM)
    prep_lin = prepare_head_params(p_lin)
    out_lin = jax.block_until_ready(head_forward(x, prep_lin))
    ref_lin = reference_head(x, p_lin)
    assert out_lin.shape == (B, OUTPUT_DIM)
    assert jnp.allclose(out_lin, ref_lin, atol=1e-5, rtol=1e-5), "Linear head mismatch"

    # --- Optional bf16-weight path (the v6e/v7x MXU optimization), loose tol ---
    prep_bf16 = prepare_head_params(p_mlp, compute_dtype=jnp.bfloat16)
    out_bf16 = jax.block_until_ready(head_forward(x, prep_bf16))
    assert out_bf16.shape == (B, OUTPUT_DIM)
    assert jnp.allclose(out_bf16, ref_mlp, atol=1e-1, rtol=1e-1), "bf16 head mismatch"

    print("KERNEL_OK")
</pallas_src>

<mosaic_0001>
module attributes {stable_mosaic.version = 11 : i64} {
  func.func @_head_mlp_kernel(%arg0: i32, %arg1: memref<8x64xf32, #tpu.memory_space<vmem>>, %arg2: memref<64x128xf32, #tpu.memory_space<vmem>>, %arg3: memref<1x128xf32, #tpu.memory_space<vmem>>, %arg4: memref<128x128xf32, #tpu.memory_space<vmem>>, %arg5: memref<1x128xf32, #tpu.memory_space<vmem>>, %arg6: memref<8x128xf32, #tpu.memory_space<vmem>>) attributes {dimension_semantics = [#tpu.dimension_semantics<parallel>], iteration_bounds = array<i64: 1>, scalar_prefetch = 0 : i64, scratch_operands = 0 : i64, tpu.core_type = #tpu.core_type<tc>, window_params = [{transform_indices = @transform_0, window_bounds = array<i64: 8, 64>}, {pipeline_mode = #tpu.pipeline_mode<synchronous>, transform_indices = @transform_1, window_bounds = array<i64: 64, 128>}, {pipeline_mode = #tpu.pipeline_mode<synchronous>, transform_indices = @transform_2, window_bounds = array<i64: 1, 128>}, {pipeline_mode = #tpu.pipeline_mode<synchronous>, transform_indices = @transform_3, window_bounds = array<i64: 128, 128>}, {pipeline_mode = #tpu.pipeline_mode<synchronous>, transform_indices = @transform_4, window_bounds = array<i64: 1, 128>}, {transform_indices = @transform_5, window_bounds = array<i64: 8, 128>}]} {
    %c0 = arith.constant 0 : index
    %c0_0 = arith.constant 0 : index
    %0 = vector.load %arg1[%c0, %c0_0] : memref<8x64xf32, #tpu.memory_space<vmem>>, vector<8x64xf32>
    %c0_1 = arith.constant 0 : index
    %c0_2 = arith.constant 0 : index
    %1 = vector.load %arg2[%c0_1, %c0_2] : memref<64x128xf32, #tpu.memory_space<vmem>>, vector<64x128xf32>
    %cst = arith.constant dense<0.000000e+00> : vector<8x128xf32>
    %2 = tpu.matmul %0, %1, %cst {dimension_numbers = #tpu.dot_dimension_numbers<[1], [0], [0], [1], [0, 0, 1, 1], [], []>} : vector<8x64xf32>, vector<64x128xf32>, vector<8x128xf32> -> vector<8x128xf32>
    %c0_3 = arith.constant 0 : index
    %c0_4 = arith.constant 0 : index
    %3 = vector.load %arg3[%c0_3, %c0_4] : memref<1x128xf32, #tpu.memory_space<vmem>>, vector<1x128xf32>
    %4 = vector.broadcast %3 : vector<1x128xf32> to vector<8x128xf32>
    %5 = arith.addf %2, %4 : vector<8x128xf32>
    %cst_5 = arith.constant 0.000000e+00 : f32
    %6 = vector.broadcast %cst_5 : f32 to vector<8x128xf32>
    %7 = arith.maximumf %5, %6 : vector<8x128xf32>
    %c0_6 = arith.constant 0 : index
    %c0_7 = arith.constant 0 : index
    %8 = vector.load %arg4[%c0_6, %c0_7] : memref<128x128xf32, #tpu.memory_space<vmem>>, vector<128x128xf32>
    %cst_8 = arith.constant dense<0.000000e+00> : vector<8x128xf32>
    %9 = tpu.matmul %7, %8, %cst_8 {dimension_numbers = #tpu.dot_dimension_numbers<[1], [0], [0], [1], [0, 0, 1, 1], [], []>} : vector<8x128xf32>, vector<128x128xf32>, vector<8x128xf32> -> vector<8x128xf32>
    %c0_9 = arith.constant 0 : index
    %c0_10 = arith.constant 0 : index
    %10 = vector.load %arg5[%c0_9, %c0_10] : memref<1x128xf32, #tpu.memory_space<vmem>>, vector<1x128xf32>
    %11 = vector.broadcast %10 : vector<1x128xf32> to vector<8x128xf32>
    %12 = arith.addf %9, %11 : vector<8x128xf32>
    %c0_11 = arith.constant 0 : index
    %c0_12 = arith.constant 0 : index
    %13 = vector.load %arg6[%c0_11, %c0_12] : memref<8x128xf32, #tpu.memory_space<vmem>>, vector<8x128xf32>
    tpu.vector_store %arg6[%c0_11, %c0_12], %12 {strides = array<i32>} : memref<8x128xf32, #tpu.memory_space<vmem>>, vector<8x128xf32>,
    return
  }
  func.func @transform_0(%arg0: i32) -> (i32, i32) {
    %c0_i32 = arith.constant 0 : i32
    %c0_i32_0 = arith.constant 0 : i32
    return %arg0, %c0_i32 : i32, i32
  }
  func.func @transform_1(%arg0: i32) -> (i32, i32) {
    %c0_i32 = arith.constant 0 : i32
    %c0_i32_0 = arith.constant 0 : i32
    %c0_i32_1 = arith.constant 0 : i32
    return %c0_i32, %c0_i32_0 : i32, i32
  }
  func.func @transform_2(%arg0: i32) -> (i32, i32) {
    %c0_i32 = arith.constant 0 : i32
    %c0_i32_0 = arith.constant 0 : i32
    %c0_i32_1 = arith.constant 0 : i32
    return %c0_i32, %c0_i32_0 : i32, i32
  }
  func.func @transform_3(%arg0: i32) -> (i32, i32) {
    %c0_i32 = arith.constant 0 : i32
    %c0_i32_0 = arith.constant 0 : i32
    %c0_i32_1 = arith.constant 0 : i32
    return %c0_i32, %c0_i32_0 : i32, i32
  }
  func.func @transform_4(%arg0: i32) -> (i32, i32) {
    %c0_i32 = arith.constant 0 : i32
    %c0_i32_0 = arith.constant 0 : i32
    %c0_i32_1 = arith.constant 0 : i32
    return %c0_i32, %c0_i32_0 : i32, i32
  }
  func.func @transform_5(%arg0: i32) -> (i32, i32) {
    %c0_i32 = arith.constant 0 : i32
    %c0_i32_0 = arith.constant 0 : i32
    return %arg0, %c0_i32 : i32, i32
  }
}

</mosaic_0001>

<bundles_post_ra>
// kernel: tpu_custom_call.1
= control target key start
LH: loop header
LB: loop body
LE: loop exit
PB: predicated region body
PF: predicated region fallthrough
CT: control target
= control target key end

     0   :  { %10 = vsyncpa [#allocation3], 0  ;;  %s328_s0 = inlined_call_operand.hbm [shape: f32[8,64], index: 0, kind: input, shape index: {}]   ;;  %s329_s1 = inlined_call_operand.hbm [shape: f32[64,128], index: 1, kind: input, shape index: {}]   ;;  %s330_s2 = inlined_call_operand.vmem [shape: f32[1,128], index: 2, kind: input, shape index: {}]   ;;  %s331_s3 = inlined_call_operand.hbm [shape: f32[128,128], index: 3, kind: input, shape index: {}]   ;;  %s332_s4 = inlined_call_operand.vmem [shape: f32[1,128], index: 4, kind: input, shape index: {}]   ;;  %s333_s5 = inlined_call_operand.hbm [shape: f32[8,128], index: 5, kind: output, shape index: {}]  }
   0x1   :  { %11 = vsyncpa [#allocation6], 0  ;;  %s28_s20 = sshll.u32 %s329_s1, 4  ;;  %s29_s20 = int_to_ptr.hbm [resolvable:$true] %s28_s20 }
   0x2   :  { %12 = vsyncpa [#allocation4], 0  ;;  %s274_s21 = smov [#allocation5]   ;;  %s18_s25 = sshll.u32 %s328_s0, 4  ;;  %s19_s25 = int_to_ptr.hbm [resolvable:$true] %s18_s25 }
   0x3   :  { %s30_s22 = sshll.u32 %s274_s21, 4  ;;  %s275_s26 = smov 128   ;;  %s31_s22 = int_to_ptr.vmem [resolvable:$true] %s30_s22 }
   0x4   :  { %s276_s27 = smov 8   ;;  %s277_s28 = smov [#allocation2]  }
   0x5   :  { %36 = dma.hbm_to_vmem [thread:$0]  %s29_s20, 1024, %s31_s22, [#allocation6], %s275_s26, %s275_s26, %s276_s27  }
   0x6   :  { %s20_s29 = sshll.u32 %s277_s28, 4  ;;  %s43_s7 = sshll.u32 %s331_s3, 4  ;;  %s21_s29 = int_to_ptr.vmem [resolvable:$true] %s20_s29  ;;  %s44_s7 = int_to_ptr.hbm [resolvable:$true] %s43_s7 }
   0x7   :  { %23 = dma.hbm_to_vmem [thread:$0]  %s19_s25, 128, %s21_s29, [#allocation3]  }
   0x8   :  { %s278_s1 = smov [#allocation7]  }
   0x9   :  { %s45_s8 = sshll.u32 %s278_s1, 4  ;;  %s46_s8 = int_to_ptr.vmem [resolvable:$true] %s45_s8 }
   0xa   :  { %51 = dma.hbm_to_vmem [thread:$0]  %s44_s7, 2048, %s46_s8, [#allocation6], %s275_s26, %s275_s26, %s276_s27  }
   0xb   :  { %268 = dma.done.wait [#allocation3], 128  }
   0xc   :  { %269 = vsyncadd [#allocation3], 4294967168 }
   0xd   :  { %270 = dma.done.wait [#allocation6], 3072  }
   0xe   :  { %271 = vsyncadd [#allocation6], 4294964224  ;;  %v74_v0 = vld [vmem:[#allocation5 + $0x38] sm:$0xff]  ;;  %v73_v1 = vld [vmem:[#allocation5 + $0x30] sm:$0xff]  ;;  %vm79_vm0 = vcmask 523264   ;;  %s279_s11 = smov [#allocation8]  }
   0xf   :  { %91 = vmatpush.msra.mxu0 %v74_v0  ;;  %v72_v2 = vld [vmem:[#allocation5 + $0x28] sm:$0xff]  ;;  %v119_v3 = vld [vmem:[#allocation7 + $0x78] sm:$0xff]  ;;  %v118_v4 = vld [vmem:[#allocation7 + $0x70] sm:$0xff]  ;;  %s150_s12 = sshll.u32 %s279_s11, 4  ;;  %s152_s15 = sshll.u32 %s333_s5, 4  ;;  %s151_s12 = int_to_ptr.vmem [resolvable:$true] %s150_s12  ;;  %s153_s15 = int_to_ptr.hbm [resolvable:$true] %s152_s15 }
  0x10   :  { %v71_v5 = vld [vmem:[#allocation5 + $0x20] sm:$0xff]  ;;  %124 = vmatpush.msra.mxu1 %v119_v3  ;;  %v117_v6 = vld [vmem:[#allocation7 + $0x68] sm:$0xff]  ;;  %v70_v7 = vld [vmem:[#allocation5 + $0x18] sm:$0xff] }
  0x11   :  { %92 = vmatpush.msra.mxu0 %v73_v1  ;;  %v116_v8 = vld [vmem:[#allocation7 + $0x60] sm:$0xff]  ;;  %v69_v9 = vld [vmem:[#allocation5 + $0x10] sm:$0xff]  ;;  %v115_v10 = vld [vmem:[#allocation7 + $0x58] sm:$0xff] }
  0x12   :  { %125 = vmatpush.msra.mxu1 %v118_v4  ;;  %v68_v11 = vld [vmem:[#allocation5 + $0x8] sm:$0xff]  ;;  %v114_v12 = vld [vmem:[#allocation7 + $0x50] sm:$0xff]  ;;  %v67_v13 = vld [vmem:[#allocation5] sm:$0xff] }
  0x13   :  { %93 = vmatpush.msra.mxu0 %v72_v2  ;;  %v66_v14 = vld [vmem:[#allocation2] sm:$0xff]  ;;  %v113_v15 = vld [vmem:[#allocation7 + $0x48] sm:$0xff]  ;;  %v112_v16 = vld [vmem:[#allocation7 + $0x40] sm:$0xff] }
  0x14   :  { %126 = vmatpush.msra.mxu1 %v117_v6  ;;  %v111_v17 = vld [vmem:[#allocation7 + $0x38] sm:$0xff]  ;;  %v110_v18 = vld [vmem:[#allocation7 + $0x30] sm:$0xff]  ;;  %v109_v19 = vld [vmem:[#allocation7 + $0x28] sm:$0xff] }
  0x15   :  { %94 = vmatpush.msra.mxu0 %v71_v5  ;;  %v108_v20 = vld [vmem:[#allocation7 + $0x20] sm:$0xff]  ;;  %v107_v21 = vld [vmem:[#allocation7 + $0x18] sm:$0xff]  ;;  %v106_v22 = vld [vmem:[#allocation7 + $0x10] sm:$0xff] }
  0x16   :  { %127 = vmatpush.msra.mxu1 %v116_v8  ;;  %v105_v23 = vld [vmem:[#allocation7 + $0x8] sm:$0xff]  ;;  %v104_v24 = vld [vmem:[#allocation7] sm:$0xff]  ;;  %v170_v25 = vld [vmem:[%s330_s2] ss:$0 sm:$0xff] }
  0x17   :  { %95 = vmatpush.msra.mxu0 %v70_v7  ;;  %v171_v29 = vld [vmem:[%s332_s4] ss:$0 sm:$0xff] }
  0x18   :  { %128 = vmatpush.msra.mxu1 %v115_v10 }
  0x19   :  { %96 = vmatpush.msra.mxu0 %v69_v9 }
  0x1a   :  { %129 = vmatpush.msra.mxu1 %v114_v12 }
  0x1b   :  { %97 = vmatpush.msra.mxu0 %v68_v11 }
  0x1c   :  { %130 = vmatpush.msra.mxu1 %v113_v15 }
  0x1d   :  { %98 = vmatpush.msra.mxu0 %v67_v13 }
  0x1e   :  { %163 = vmatmul.msk.f32.vlgmr.msra.gmra.mxu0 %vm79_vm0, %v66_v14  ;;  %131 = vmatpush.msra.mxu1 %v112_v16 }
  0x20   :  { %132 = vmatpush.msra.mxu1 %v111_v17 }
  0x22   :  { %133 = vmatpush.msra.mxu1 %v110_v18 }
  0x24   :  { %134 = vmatpush.msra.mxu1 %v109_v19 }
  0x26   :  { %135 = vmatpush.msra.mxu1 %v108_v20 }
  0x28   :  { %136 = vmatpush.msra.mxu1 %v107_v21 }
  0x2a   :  { %137 = vmatpush.msra.mxu1 %v106_v22 }
  0x2c   :  { %138 = vmatpush.msra.mxu1 %v105_v23 }
  0x2e   :  { %139 = vmatpush.msra.mxu1 %v104_v24 }
  0x9b   :  { %v100_v26 = vpop.f32.mrf.mxu0 }
  0x9c   :  { %v101_v27 = vadd.f32 %v170_v25, %v100_v26 }
  0x9e   :  { %v103_v28 = vmax.f32 %v101_v27, 0.0 }
  0xa0   :  { %140 = vmatmul.f32.vlgmr.msra.gmra.mxu1 %v103_v28 }
 0x11d   :  { %v141_v30 = vpop.f32.mrf.mxu1 }
 0x11e   :  { %v142_v31 = vadd.f32 %v171_v29, %v141_v30 }
 0x120   :  { %144 = vst [vmem:[#allocation8] sm:$0xff] %v142_v31 }
 0x121   :  { %155 = dma.vmem_to_hbm [thread:$0]  %s151_s12, 128, %s153_s15, [#allocation4]  }
 0x122   :  { %272 = dma.done.wait [#allocation4], 128  }
 0x123   :  { %273 = vsyncadd [#allocation4], 4294967168 }
 0x124   :  { %160 = vsyncpa [#allocation3], 1 }
 0x125   :  { %161 = vsyncpa [#allocation6], 1 }
 0x126   :  { %162 = vsyncpa [#allocation4], 1 }

</bundles_post_ra>
